<compile_context>
chip_gen: v5e
topology: v5e:2x2
jax: 0.10.0
libtpu: 0.0.40
codegen_flags: <defaults>
</compile_context>

<pallas_src>
import jax
import jax.numpy as jnp
from jax.experimental import pallas as pl
from jax.experimental.pallas import tpu as pltpu


def _pointwise_conv_kernel(x_ref, w_ref, b_ref, o_ref):
    # x_ref: (1, Cin, TL)  w_ref: (Cout, Cin)  b_ref: (Cout, 1)  o_ref: (1, Cout, TL)
    acc = jnp.dot(w_ref[...], x_ref[0], preferred_element_type=jnp.float32)
    o_ref[0] = (acc + b_ref[...]).astype(o_ref.dtype)


_L_TILE_CANDIDATES = (4096, 2048, 1024, 512, 256, 128)
_ACT_TILE_BUDGET = 20 << 20  # budget for double-buffered x + out tiles


def _pick_l_tile(L, Cin, Cout, itemsize):
    """Largest 128-multiple TL whose double-buffered x/out tiles fit the budget."""
    if L <= 128:
        return L  # full-extent block (block_shape == array dim) is always legal
    per_col = 2 * (Cin + Cout) * itemsize * 2  # 2 buffers x (x col + out col)
    for cand in _L_TILE_CANDIDATES:
        if cand <= L and cand * per_col <= _ACT_TILE_BUDGET:
            return cand
    return 128


def pointwise_conv(x, weight, bias, *, l_tile=None):
    """Conv1d with kernel_size=1.

    Args:
      x:      (N, C_in, L)  -- PyTorch NCL layout
      weight: (C_out, C_in, 1)
      bias:   (C_out,)
    Returns:
      (N, C_out, L)
    """
    N, Cin, L = x.shape
    Cout = weight.shape[0]
    itemsize = jnp.dtype(x.dtype).itemsize

    if l_tile is None:
        TL = _pick_l_tile(L, Cin, Cout, itemsize)
        # v7x megacore balance: if the grid is tiny, trade a few 0.35 us grid
        # steps for keeping both TensorCores busy.
        while TL >= 256 and N * pl.cdiv(L, TL) < 4:
            TL //= 2
    else:
        TL = l_tile

    num_l_tiles = pl.cdiv(L, TL)
    grid = (N, num_l_tiles)

    # Weight in activation dtype (native MXU path; halves resident W for bf16),
    # f32 accumulation happens inside the kernel via preferred_element_type.
    w = weight[:, :, 0].astype(x.dtype)
    b = bias.astype(jnp.float32).reshape(Cout, 1)

    # Explicit VMEM budget: double-buffered activation tiles + single-buffered
    # W/bias + headroom. Clamped to [32 MiB, 48 MiB] -- above the v5e (16 MiB)
    # and v6e/v7x (32 MiB) scoped defaults, under v7x's 64 MiB physical VMEM.
    x_tile_bytes = Cin * TL * itemsize
    o_tile_bytes = Cout * TL * itemsize
    w_bytes = Cout * Cin * jnp.dtype(w.dtype).itemsize
    vmem_need = 2 * (x_tile_bytes + o_tile_bytes) + w_bytes + Cout * 4
    vmem_limit = int(min(max(vmem_need + (8 << 20), 32 << 20), 48 << 20))

    # Deeper x prefetch only when tiles are small (exposed DMA latency on v5e).
    if TL <= 256 and num_l_tiles > 2:
        x_spec = pl.BlockSpec((1, Cin, TL), lambda n, l: (n, 0, l),
                              pipeline_mode=pl.Buffered(3))
    else:
        x_spec = pl.BlockSpec((1, Cin, TL), lambda n, l: (n, 0, l))

    cost = pl.CostEstimate(
        flops=2 * N * Cout * Cin * L,
        transcendentals=0,
        bytes_accessed=(N * Cin * L * itemsize            # x
                        + w_bytes                          # weight
                        + Cout * 4                         # bias
                        + N * Cout * L * itemsize),        # out
    )

    return pl.pallas_call(
        _pointwise_conv_kernel,
        out_shape=jax.ShapeDtypeStruct((N, Cout, L), x.dtype),
        grid_spec=pltpu.PrefetchScalarGridSpec(
            num_scalar_prefetch=0,
            grid=grid,
            in_specs=[
                # Input tile: L on the lane axis, Cin (contraction) fully resident.
                x_spec,
                # Weights: constant block index -> DMAed once; single buffer.
                pl.BlockSpec((Cout, Cin), lambda n, l: (0, 0),
                             pipeline_mode=pl.Buffered(1)),
                # Bias: constant block index; single buffer.
                pl.BlockSpec((Cout, 1), lambda n, l: (0, 0),
                             pipeline_mode=pl.Buffered(1)),
            ],
            # Output tile is lane-dense along L (dense vst; partial last tile masked).
            out_specs=pl.BlockSpec((1, Cout, TL), lambda n, l: (n, 0, l)),
        ),
        compiler_params=pltpu.CompilerParams(
            dimension_semantics=("parallel", "parallel"),
            vmem_limit_bytes=vmem_limit),
        cost_estimate=cost,
    )(x, w, b)


if __name__ == "__main__":
    # Small shapes consistent with Conv1d forward: (batch, in_channels, seq)
    batch, in_channels, out_channels, seq = 2, 16, 32, 8

    key = jax.random.PRNGKey(0)
    k_x, k_w, k_b = jax.random.split(key, 3)

    # Deterministic init mirroring PyTorch Conv1d default: U(-k, k), k = 1/sqrt(C_in * ksize)
    bound = 1.0 / (in_channels ** 0.5)
    x = jax.random.normal(k_x, (batch, in_channels, seq), dtype=jnp.float32)
    weight = jax.random.uniform(
        k_w, (out_channels, in_channels, 1), minval=-bound, maxval=bound,
        dtype=jnp.float32)
    bias = jax.random.uniform(
        k_b, (out_channels,), minval=-bound, maxval=bound, dtype=jnp.float32)

    out = pointwise_conv(x, weight, bias)
    out = jax.block_until_ready(out)

    # Pure-JAX reference (Conv1d with kernel_size=1 == channel matmul)
    ref = jnp.einsum("ncl,oc->nol", x, weight[:, :, 0]) + bias[None, :, None]
    assert out.shape == (batch, out_channels, seq)
    assert jnp.allclose(out, ref, atol=1e-5, rtol=1e-5)

    print("KERNEL_OK")
</pallas_src>

<mosaic_0001>
module attributes {stable_mosaic.version = 11 : i64} {
  func.func @_pointwise_conv_kernel(%arg0: i32, %arg1: i32, %arg2: memref<1x16x8xf32, #tpu.memory_space<vmem>>, %arg3: memref<32x16xf32, #tpu.memory_space<vmem>>, %arg4: memref<32x1xf32, #tpu.memory_space<vmem>>, %arg5: memref<1x32x8xf32, #tpu.memory_space<vmem>>) attributes {dimension_semantics = [#tpu.dimension_semantics<parallel>, #tpu.dimension_semantics<parallel>], iteration_bounds = array<i64: 2, 1>, scalar_prefetch = 0 : i64, scratch_operands = 0 : i64, tpu.core_type = #tpu.core_type<tc>, window_params = [{transform_indices = @transform_0, window_bounds = array<i64: 1, 16, 8>}, {pipeline_mode = #tpu.pipeline_mode<synchronous>, transform_indices = @transform_1, window_bounds = array<i64: 32, 16>}, {pipeline_mode = #tpu.pipeline_mode<synchronous>, transform_indices = @transform_2, window_bounds = array<i64: 32, 1>}, {transform_indices = @transform_3, window_bounds = array<i64: 1, 32, 8>}]} {
    %c0 = arith.constant 0 : index
    %c0_0 = arith.constant 0 : index
    %0 = vector.load %arg3[%c0, %c0_0] : memref<32x16xf32, #tpu.memory_space<vmem>>, vector<32x16xf32>
    %c0_1 = arith.constant 0 : index
    %c0_2 = arith.constant 0 : index
    %c0_3 = arith.constant 0 : index
    %1 = vector.load %arg2[%c0_1, %c0_2, %c0_3] : memref<1x16x8xf32, #tpu.memory_space<vmem>>, vector<1x16x8xf32>
    %2 = vector.shape_cast %1 : vector<1x16x8xf32> to vector<16x8xf32>
    %cst = arith.constant dense<0.000000e+00> : vector<32x8xf32>
    %3 = tpu.matmul %0, %2, %cst {dimension_numbers = #tpu.dot_dimension_numbers<[1], [0], [0], [1], [0, 0, 1, 1], [], []>} : vector<32x16xf32>, vector<16x8xf32>, vector<32x8xf32> -> vector<32x8xf32>
    %c0_4 = arith.constant 0 : index
    %c0_5 = arith.constant 0 : index
    %4 = vector.load %arg4[%c0_4, %c0_5] : memref<32x1xf32, #tpu.memory_space<vmem>>, vector<32x1xf32>
    %5 = vector.broadcast %4 : vector<32x1xf32> to vector<32x8xf32>
    %6 = arith.addf %3, %5 : vector<32x8xf32>
    %c0_6 = arith.constant 0 : index
    %c0_7 = arith.constant 0 : index
    %c0_8 = arith.constant 0 : index
    %7 = vector.load %arg5[%c0_6, %c0_7, %c0_8] : memref<1x32x8xf32, #tpu.memory_space<vmem>>, vector<1x32x8xf32>
    %8 = vector.shape_cast %7 : vector<1x32x8xf32> to vector<32x8xf32>
    %9 = vector.shape_cast %6 : vector<32x8xf32> to vector<1x32x8xf32>
    tpu.vector_store %arg5[%c0_6, %c0_7, %c0_8], %9 {strides = array<i32>} : memref<1x32x8xf32, #tpu.memory_space<vmem>>, vector<1x32x8xf32>,
    return
  }
  func.func @transform_0(%arg0: i32, %arg1: i32) -> (i32, i32, i32) {
    %c0_i32 = arith.constant 0 : i32
    %c0_i32_0 = arith.constant 0 : i32
    return %arg0, %c0_i32, %arg1 : i32, i32, i32
  }
  func.func @transform_1(%arg0: i32, %arg1: i32) -> (i32, i32) {
    %c0_i32 = arith.constant 0 : i32
    %c0_i32_0 = arith.constant 0 : i32
    %c0_i32_1 = arith.constant 0 : i32
    return %c0_i32, %c0_i32_0 : i32, i32
  }
  func.func @transform_2(%arg0: i32, %arg1: i32) -> (i32, i32) {
    %c0_i32 = arith.constant 0 : i32
    %c0_i32_0 = arith.constant 0 : i32
    %c0_i32_1 = arith.constant 0 : i32
    return %c0_i32, %c0_i32_0 : i32, i32
  }
  func.func @transform_3(%arg0: i32, %arg1: i32) -> (i32, i32, i32) {
    %c0_i32 = arith.constant 0 : i32
    %c0_i32_0 = arith.constant 0 : i32
    return %arg0, %c0_i32, %arg1 : i32, i32, i32
  }
}

</mosaic_0001>

<bundles_post_ra>
// kernel: tpu_custom_call.1
= control target key start
LH: loop header
LB: loop body
LE: loop exit
PB: predicated region body
PF: predicated region fallthrough
CT: control target
= control target key end

     0   :  { %s457_s12 = smov 0   ;;  %s459_s13 = smov 0   ;;  %s518_s0 = inlined_call_operand.vmem [shape: f32[2,16,8], index: 0, kind: input, shape index: {}]   ;;  %s519_s1 = inlined_call_operand.vmem [shape: f32[32,16], index: 1, kind: input, shape index: {}]   ;;  %s520_s2 = inlined_call_operand.vmem [shape: f32[32,1], index: 2, kind: input, shape index: {}]   ;;  %s521_s3 = inlined_call_operand.vmem [shape: f32[2,32,8], index: 3, kind: output, shape index: {}]  }
   0x1   :  { %s461_s14 = smov 0  }
   0x2 LB: > { %s25_s15 = sadd.s32 1, %s430_s13  ;;  %p366_p0 = scmp.ge.s32.totalorder %s434_s14, 1  ;;  %s434_s14 = sphi %s461_s14, %s13_s14   ;;  %s430_s13 = sphi %s459_s13, %s523_s13   ;;  %s426_s12 = sphi %s457_s12, %s522_s12  }
   0x3   : > { %p27_p1 = scmp.ge.s32.totalorder %s25_s15, 2  ;;  %p156_p2 = scmp.lt.s32.totalorder %s434_s14, 3 }
   0x5   : > { %s525_s15 = smov (%p27_p1, %s25_s15), 0  ;;  %p157_p3 = pnand %p366_p0, %p156_p2 }
   0x6   : > { %p186_p4 = scmp.lt.s32.totalorder (!%p157_p3), %s426_s12, 1 }
   0x7   : > { %160 = sbr.rel (%p157_p3) target bundleno = 157 (0x9d), region = 32 }
   0xc   : > { %v436_v0 = vmov 0   ;;  %v210_v1 = vld [vmem:[%s520_s2 + $0x10] sm:$0xff]  ;;  %v208_v2 = vld [vmem:[%s520_s2] sm:$0xff]  ;;  %s527_s12 = smov (!%p186_p4, %s426_s12), 1  ;;  %vm232_vm0 = vcmask 130048   ;;  %v203_v6 = vld [vmem:[%s519_s1 + $0x8] sm:$0xff] }
   0xd   : > { %411 = vset.pattern.permute.xlu1 %v436_v0  ;;  %410 = vset.pattern.permute.xlu0 %v436_v0  ;;  %s377_s20 = sshll.u32 %s527_s12, 4  ;;  %v202_v5 = vld [vmem:[%s519_s1] sm:$0xff]  ;;  %v204_v7 = vld [vmem:[%s519_s1 + $0x10] sm:$0xff]  ;;  %v205_v8 = vld [vmem:[%s519_s1 + $0x18] sm:$0xff]  ;;  %s378_s9 = sshll.u32 %s527_s12, 5  ;;  %vm274_vm1 = vcmask 64512  }
   0xe   : > { %224 = vperm.xlu1 %411, %v210_v1   ;;  %214 = vperm.xlu0 %410, %v208_v2   ;;  %s193_s23 = scalar_lea.vmem %s518_s0, %s377_s20  ;;  %v211_v9 = vld [vmem:[%s520_s2 + $0x18] sm:$0xff]  ;;  %v209_v10 = vld [vmem:[%s520_s2 + $0x8] sm:$0xff]  ;;  %s201_s16 = scalar_lea.vmem %s521_s3, %s378_s9 }
   0xf   : > { %v207_v3 = vld [vmem:[%s193_s23 + $0x8] sm:$0xff]  ;;  %v206_v4 = vld [vmem:[%s193_s23] sm:$0xff] }
  0x10   : > { %259 = vmatpush.msra.mxu0 %v207_v3  ;;  %379 = vmatpush.msra.mxu1 %v207_v3 }
  0x11   : > { %380 = vmatpush.msra.mxu2 %v207_v3  ;;  %381 = vmatpush.msra.mxu3 %v207_v3 }
  0x12   : > { %260 = vmatpush.msra.mxu0 %v206_v4  ;;  %382 = vmatpush.msra.mxu1 %v206_v4 }
  0x13   : > { %383 = vmatpush.msra.mxu2 %v206_v4  ;;  %384 = vmatpush.msra.mxu3 %v206_v4 }
  0x14   : > { %371 = vmatmul.msk.f32.vlgmr.msra.gmra.mxu0 %vm232_vm0, %v202_v5  ;;  %372 = vmatmul.msk.f32.vlgmr.msra.gmra.mxu1 %vm232_vm0, %v203_v6 }
  0x15   : > { %373 = vmatmul.msk.f32.vlgmr.msra.gmra.mxu2 %vm232_vm0, %v204_v7  ;;  %374 = vmatmul.msk.f32.vlgmr.msra.gmra.mxu3 %vm232_vm0, %v205_v8 }
  0x16   : > { %229 = vperm.xlu1 %411, %v211_v9   ;;  %219 = vperm.xlu0 %410, %v209_v10  }
  0x80   : > { %v215_v11 = vpop.permute.xlu0 %214  ;;  %v225_v12 = vpop.permute.xlu1 %224 }
  0x88   : > { %v220_v13 = vpop.permute.xlu0 %219  ;;  %v230_v18 = vpop.permute.xlu1 %229 }
  0x91   : > { %v262_v14 = vpop.f32.mrf.mxu0  ;;  %v265_v15 = vpop.f32.mrf.mxu1 }
  0x92   : > { %v263_v16 = vadd.f32 %v262_v14, %v215_v11  ;;  %v266_v17 = vadd.f32 %v265_v15, %v220_v13 }
  0x94   : > { %275 = vst.msk [vmem:[%s201_s16] sm:$0xff] %vm274_vm1, %v263_v16 }
  0x95   : > { %276 = vst.msk [vmem:[%s201_s16 + $0x8] sm:$0xff] %vm274_vm1, %v266_v17 }
  0x98   : > { %v268_v19 = vpop.f32.mrf.mxu2  ;;  %v271_v20 = vpop.f32.mrf.mxu3 }
  0x99   : > { %v269_v21 = vadd.f32 %v268_v19, %v225_v12  ;;  %v272_v22 = vadd.f32 %v271_v20, %v230_v18 }
  0x9b   : > { %277 = vst.msk [vmem:[%s201_s16 + $0x10] sm:$0xff] %vm274_vm1, %v269_v21 }
  0x9c   : > { %278 = vst.msk [vmem:[%s201_s16 + $0x18] sm:$0xff] %vm274_vm1, %v272_v22 }
  0x9d PF: > { %s13_s14 = sadd.s32 1, %s434_s14   ;;  %s522_s12 = smov %s430_s13 }
  0x9e   : > { %p10_p5 = scmp.ge.s32.totalorder %s13_s14, 4   ;;  %s523_s13 = smov %s525_s15 }
  0xa0   :  { %12 = sbr.rel (!%p10_p5) target bundleno = 2 (0x2), region = 62 }

</bundles_post_ra>
